<compile_context>
chip_gen: v6e
topology: v6e:2x2x1
jax: 0.10.0
libtpu: 0.0.40
codegen_flags: <defaults>
</compile_context>

<pallas_src>
import functools

import jax
import jax.numpy as jnp
from jax import lax
from jax.experimental import pallas as pl
from jax.experimental.pallas import tpu as pltpu


def _round_up(x, m):
    return (x + m - 1) // m * m


def _mf_score_kernel(uidx_ref, iidx_ref, uembT_ref, iembT_ref, out_ref, *,
                     kc_u, kc_i):
    """Scores one batch tile.

    uidx_ref, iidx_ref : (1, TB)            int32 indices (lane axis)
    uembT_ref          : (Dp, n_users_p)    f32 user table, transposed, VMEM-resident
    iembT_ref          : (Dp, n_items_p)    f32 item table, transposed, VMEM-resident
    out_ref            : (1, TB)            f32 scores (lane-dense)
    kc_u, kc_i         : static contraction chunk sizes (multiples of 128)
    """
    u_idx = uidx_ref[...]                       # (1, TB) int32
    i_idx = iidx_ref[...]                       # (1, TB) int32
    tb = u_idx.shape[-1]
    d = uembT_ref.shape[0]

    # One iota per chunk width, hoisted out of the chunk loops; shared between
    # the two tables when their chunk widths match.
    iota_u = lax.broadcasted_iota(jnp.int32, (kc_u, tb), 0)
    iota_i = iota_u if kc_i == kc_u else lax.broadcasted_iota(
        jnp.int32, (kc_i, tb), 0)

    def gather(embT_ref, idx, iota, kc):
        """One-hot MXU gather, K-tiled over table rows: returns (d, tb) f32."""
        n_rows = embT_ref.shape[-1]
        acc = jnp.zeros((d, tb), jnp.float32)
        for c in range(n_rows // kc):           # static, short, fully unrolled
            base = c * kc
            # One-hot built directly in the matmul operand dtype (0/1 exact).
            oh = (iota == (idx - base)).astype(jnp.float32)          # (kc, tb)
            acc = acc + jnp.dot(embT_ref[:, base:base + kc], oh,
                                preferred_element_type=jnp.float32)  # (d, tb)
        return acc

    u_vec = gather(uembT_ref, u_idx, iota_u, kc_u)
    i_vec = gather(iembT_ref, i_idx, iota_i, kc_i)

    # Per-row dot product: elementwise multiply, reduce over D (sublane axis),
    # landing directly in the lane-dense (1, TB) output layout.
    out_ref[...] = jnp.sum(u_vec * i_vec, axis=0, keepdims=True)


def mf_score(user_indices, item_indices, user_emb, item_emb, *,
             max_tile_b=512, max_kc=256):
    """Pallas equivalent of Model.forward."""
    B = user_indices.shape[0]
    n_users, D = user_emb.shape
    n_items, D_i = item_emb.shape
    assert D == D_i

    # ---- batch tiling: lane-dense (1, TB) tiles; >= 2 tiles once padded batch
    # reaches 256 so v7x's two TensorCores both get work. -----------------------
    Bp0 = _round_up(B, 128)
    if Bp0 >= 256:
        TB = max(128, min(max_tile_b, _round_up(Bp0 // 2, 128)))
    else:
        TB = Bp0
    Bp = _round_up(Bp0, TB)
    num_tiles = Bp // TB

    # ---- contraction (table-row) chunking: multiples of 128, capped at max_kc.
    kc_u = min(max_kc, _round_up(n_users, 128))
    kc_i = min(max_kc, _round_up(n_items, 128))
    nu_p = _round_up(n_users, kc_u)
    ni_p = _round_up(n_items, kc_i)
    D_p = _round_up(D, 8)

    # Indices as lane-dense (1, Bp) vectors; padding gathers row 0 (discarded).
    uidx = jnp.pad(user_indices.astype(jnp.int32), (0, Bp - B)).reshape(1, Bp)
    iidx = jnp.pad(item_indices.astype(jnp.int32), (0, Bp - B)).reshape(1, Bp)

    # Transpose + zero-pad tables once (layout plumbing): D on sublanes,
    # rows on lanes.  Padded rows/dims are zero and never selected.
    uembT = jnp.pad(user_emb.astype(jnp.float32).T,
                    ((0, D_p - D), (0, nu_p - n_users)))
    iembT = jnp.pad(item_emb.astype(jnp.float32).T,
                    ((0, D_p - D), (0, ni_p - n_items)))

    # Explicit VMEM budget: resident tables (single-buffered) + per-step
    # working set (one-hot chunks, accumulators, pipelined index/output tiles).
    table_bytes = (uembT.size + iembT.size) * 4
    work_bytes = ((kc_u + kc_i) * TB * 4          # one-hot chunks
                  + 2 * D_p * TB * 4              # gather accumulators
                  + 2 * 3 * TB * 4)               # double-buffered idx/out tiles
    vmem_limit = int(min(96 * 1024 * 1024,
                         max(32 * 1024 * 1024, 2 * (table_bytes + work_bytes))))

    kernel = functools.partial(_mf_score_kernel, kc_u=kc_u, kc_i=kc_i)

    out = pl.pallas_call(
        kernel,
        grid=(num_tiles,),
        in_specs=[
            pl.BlockSpec((1, TB), lambda i: (0, i)),           # user index tile
            pl.BlockSpec((1, TB), lambda i: (0, i)),           # item index tile
            # Whole tables placed in VMEM once, single-buffered (no pipelining).
            pl.BlockSpec(memory_space=pltpu.MemorySpace.VMEM),  # user table
            pl.BlockSpec(memory_space=pltpu.MemorySpace.VMEM),  # item table
        ],
        out_specs=pl.BlockSpec((1, TB), lambda i: (0, i)),      # lane-dense scores
        out_shape=jax.ShapeDtypeStruct((1, Bp), jnp.float32),
        compiler_params=pltpu.CompilerParams(
            dimension_semantics=("parallel",),
            vmem_limit_bytes=vmem_limit),
    )(uidx, iidx, uembT, iembT)

    return out[0, :B]


if __name__ == "__main__":
    # Model hyper-parameters (small, consistent with the module's __init__).
    n_users = 16
    n_items = 32
    embedding_size = 32
    batch = 8

    key = jax.random.PRNGKey(0)
    k_u, k_i, k_ui, k_ii = jax.random.split(key, 4)

    # torch.nn.Embedding default init: N(0, 1).
    user_emb = jax.random.normal(k_u, (n_users, embedding_size), jnp.float32)
    item_emb = jax.random.normal(k_i, (n_items, embedding_size), jnp.float32)

    user_indices = jax.random.randint(k_ui, (batch,), 0, n_users, jnp.int32)
    item_indices = jax.random.randint(k_ii, (batch,), 0, n_items, jnp.int32)

    scores = jax.jit(mf_score)(user_indices, item_indices, user_emb, item_emb)
    scores = jax.block_until_ready(scores)

    # Pure-JAX reference check of forward semantics.
    ref = jnp.sum(
        jnp.take(user_emb, user_indices, axis=0)
        * jnp.take(item_emb, item_indices, axis=0),
        axis=-1,
    )
    assert scores.shape == (batch,)
    assert jnp.allclose(scores, ref, atol=1e-4, rtol=1e-4)

    print("KERNEL_OK")
</pallas_src>

<mosaic_0001>
module attributes {stable_mosaic.version = 11 : i64} {
  func.func @_mf_score_kernel(%arg0: i32, %arg1: memref<1x128xi32, #tpu.memory_space<vmem>>, %arg2: memref<1x128xi32, #tpu.memory_space<vmem>>, %arg3: memref<32x128xf32, #tpu.memory_space<vmem>>, %arg4: memref<32x128xf32, #tpu.memory_space<vmem>>, %arg5: memref<1x128xf32, #tpu.memory_space<vmem>>) attributes {dimension_semantics = [#tpu.dimension_semantics<parallel>], iteration_bounds = array<i64: 1>, scalar_prefetch = 0 : i64, scratch_operands = 0 : i64, tpu.core_type = #tpu.core_type<tc>, window_params = [{transform_indices = @transform_0, window_bounds = array<i64: 1, 128>}, {transform_indices = @transform_1, window_bounds = array<i64: 1, 128>}, {pipeline_mode = #tpu.pipeline_mode<synchronous>, transform_indices = @transform_2, window_bounds = array<i64: 32, 128>}, {pipeline_mode = #tpu.pipeline_mode<synchronous>, transform_indices = @transform_3, window_bounds = array<i64: 32, 128>}, {transform_indices = @transform_4, window_bounds = array<i64: 1, 128>}]} {
    %c0 = arith.constant 0 : index
    %c0_0 = arith.constant 0 : index
    %0 = vector.load %arg1[%c0, %c0_0] : memref<1x128xi32, #tpu.memory_space<vmem>>, vector<1x128xi32>
    %c0_1 = arith.constant 0 : index
    %c0_2 = arith.constant 0 : index
    %1 = vector.load %arg2[%c0_1, %c0_2] : memref<1x128xi32, #tpu.memory_space<vmem>>, vector<1x128xi32>
    %2 = tpu.iota {dimensions = array<i32: 0>} : vector<128x128xi32>
    %cst = arith.constant 0.000000e+00 : f32
    %3 = vector.broadcast %cst : f32 to vector<32x128xf32>
    %c0_i32 = arith.constant 0 : i32
    %4 = vector.broadcast %c0_i32 : i32 to vector<1x128xi32>
    %5 = arith.subi %0, %4 : vector<1x128xi32>
    %6 = vector.broadcast %5 : vector<1x128xi32> to vector<128x128xi32>
    %7 = arith.cmpi eq, %2, %6 : vector<128x128xi32>
    %8 = arith.extui %7 : vector<128x128xi1> to vector<128x128xi32>
    %9 = arith.sitofp %8 : vector<128x128xi32> to vector<128x128xf32>
    %c0_3 = arith.constant 0 : index
    %c0_4 = arith.constant 0 : index
    %10 = vector.load %arg3[%c0_3, %c0_4] : memref<32x128xf32, #tpu.memory_space<vmem>>, vector<32x128xf32>
    %cst_5 = arith.constant dense<0.000000e+00> : vector<32x128xf32>
    %11 = tpu.matmul %10, %9, %cst_5 {dimension_numbers = #tpu.dot_dimension_numbers<[1], [0], [0], [1], [0, 0, 1, 1], [], []>} : vector<32x128xf32>, vector<128x128xf32>, vector<32x128xf32> -> vector<32x128xf32>
    %12 = arith.addf %3, %11 : vector<32x128xf32>
    %cst_6 = arith.constant 0.000000e+00 : f32
    %13 = vector.broadcast %cst_6 : f32 to vector<32x128xf32>
    %c0_i32_7 = arith.constant 0 : i32
    %14 = vector.broadcast %c0_i32_7 : i32 to vector<1x128xi32>
    %15 = arith.subi %1, %14 : vector<1x128xi32>
    %16 = vector.broadcast %15 : vector<1x128xi32> to vector<128x128xi32>
    %17 = arith.cmpi eq, %2, %16 : vector<128x128xi32>
    %18 = arith.extui %17 : vector<128x128xi1> to vector<128x128xi32>
    %19 = arith.sitofp %18 : vector<128x128xi32> to vector<128x128xf32>
    %c0_8 = arith.constant 0 : index
    %c0_9 = arith.constant 0 : index
    %20 = vector.load %arg4[%c0_8, %c0_9] : memref<32x128xf32, #tpu.memory_space<vmem>>, vector<32x128xf32>
    %cst_10 = arith.constant dense<0.000000e+00> : vector<32x128xf32>
    %21 = tpu.matmul %20, %19, %cst_10 {dimension_numbers = #tpu.dot_dimension_numbers<[1], [0], [0], [1], [0, 0, 1, 1], [], []>} : vector<32x128xf32>, vector<128x128xf32>, vector<32x128xf32> -> vector<32x128xf32>
    %22 = arith.addf %13, %21 : vector<32x128xf32>
    %23 = arith.mulf %12, %22 : vector<32x128xf32>
    %cst_11 = arith.constant dense<0.000000e+00> : vector<128xf32>
    %24 = vector.multi_reduction <add>, %23, %cst_11 [0] : vector<32x128xf32> to vector<128xf32>
    %25 = vector.shape_cast %24 : vector<128xf32> to vector<1x128xf32>
    %c0_12 = arith.constant 0 : index
    %c0_13 = arith.constant 0 : index
    %26 = vector.load %arg5[%c0_12, %c0_13] : memref<1x128xf32, #tpu.memory_space<vmem>>, vector<1x128xf32>
    tpu.vector_store %arg5[%c0_12, %c0_13], %25 {strides = array<i32>} : memref<1x128xf32, #tpu.memory_space<vmem>>, vector<1x128xf32>,
    return
  }
  func.func @transform_0(%arg0: i32) -> (i32, i32) {
    %c0_i32 = arith.constant 0 : i32
    %c0_i32_0 = arith.constant 0 : i32
    return %c0_i32, %arg0 : i32, i32
  }
  func.func @transform_1(%arg0: i32) -> (i32, i32) {
    %c0_i32 = arith.constant 0 : i32
    %c0_i32_0 = arith.constant 0 : i32
    return %c0_i32, %arg0 : i32, i32
  }
  func.func @transform_2(%arg0: i32) -> (i32, i32) {
    %c0_i32 = arith.constant 0 : i32
    %c0_i32_0 = arith.constant 0 : i32
    %c0_i32_1 = arith.constant 0 : i32
    return %c0_i32, %c0_i32_0 : i32, i32
  }
  func.func @transform_3(%arg0: i32) -> (i32, i32) {
    %c0_i32 = arith.constant 0 : i32
    %c0_i32_0 = arith.constant 0 : i32
    %c0_i32_1 = arith.constant 0 : i32
    return %c0_i32, %c0_i32_0 : i32, i32
  }
  func.func @transform_4(%arg0: i32) -> (i32, i32) {
    %c0_i32 = arith.constant 0 : i32
    %c0_i32_0 = arith.constant 0 : i32
    return %c0_i32, %arg0 : i32, i32
  }
}

</mosaic_0001>

<bundles_post_ra>
// kernel: mf_score.1
= control target key start
LH: loop header
LB: loop body
LE: loop exit
PB: predicated region body
PF: predicated region fallthrough
CT: control target
= control target key end

     0   :  { %v19_v0 = vlaneseq  ;;  %v519_v10 = vmov 1.0   ;;  %s697_s0 = inlined_call_operand.vmem [shape: s32[1,128], index: 0, kind: input, shape index: {}]   ;;  %s698_s1 = inlined_call_operand.vmem [shape: s32[1,128], index: 1, kind: input, shape index: {}]   ;;  %s699_s2 = inlined_call_operand.vmem [shape: f32[32,128], index: 2, kind: input, shape index: {}]   ;;  %s700_s3 = inlined_call_operand.vmem [shape: f32[32,128], index: 3, kind: input, shape index: {}]   ;;  %s701_s4 = inlined_call_operand.vmem [shape: f32[1,128], index: 4, kind: output, shape index: {}]  }
   0x1   :  { %v88_v1 = vld [vmem:[%s699_s2] sm:$0xff]  ;;  %v89_v22 = vld [vmem:[%s699_s2 + $0x8] sm:$0xff]  ;;  %v90_v24 = vld [vmem:[%s699_s2 + $0x10] sm:$0xff] }
   0x2   :  { %v548_v2 = vshrl.u32 %v19_v0, 7  ;;  %474 = vmatprep.mubr.f32.mxu0 %v88_v1  ;;  %v229_v3 = vld [vmem:[%s700_s3] sm:$0xff]  ;;  %v230_v23 = vld [vmem:[%s700_s3 + $0x8] sm:$0xff]  ;;  %v231_v25 = vld [vmem:[%s700_s3 + $0x10] sm:$0xff] }
   0x3   :  { %v556_v4 = vld [vmem:[%s697_s0] ss:$0 sm:$0xff]  ;;  %512 = vmatprep.mubr.f32.mxu1 %v229_v3  ;;  %v91_v26 = vld [vmem:[%s699_s2 + $0x18] sm:$0xff] }
   0x4   :  { %v561_v5 = vld [vmem:[%s698_s1] ss:$0 sm:$0xff]  ;;  %v35_v6 = vadd.s32 120, %v548_v2  ;;  %v34_v7 = vadd.s32 112, %v548_v2  ;;  %v33_v8 = vadd.s32 104, %v548_v2  ;;  %v32_v9 = vadd.s32 96, %v548_v2 }
   0x5   :  { %v31_v11 = vadd.s32 88, %v548_v2  ;;  %v30_v12 = vadd.s32 80, %v548_v2  ;;  %v29_v13 = vadd.s32 72, %v548_v2  ;;  %v28_v14 = vadd.s32 64, %v548_v2  ;;  %v232_v27 = vld [vmem:[%s700_s3 + $0x18] sm:$0xff] }
   0x6   :  { %vm55_vm0 = vcmp.eq.s32.totalorder %v35_v6, %v556_v4  ;;  %vm196_vm1 = vcmp.eq.s32.totalorder %v35_v6, %v561_v5  ;;  %vm54_vm2 = vcmp.eq.s32.totalorder %v34_v7, %v556_v4  ;;  %vm195_vm3 = vcmp.eq.s32.totalorder %v34_v7, %v561_v5 }
   0x7   :  { %442 = vmatprep.subr.msk.mxu0 %vm55_vm0, %v519_v10  ;;  %480 = vmatprep.subr.msk.mxu1 %vm196_vm1, %v519_v10  ;;  %vm53_vm4 = vcmp.eq.s32.totalorder %v33_v8, %v556_v4  ;;  %vm194_vm5 = vcmp.eq.s32.totalorder %v33_v8, %v561_v5  ;;  %vm52_vm6 = vcmp.eq.s32.totalorder %v32_v9, %v556_v4  ;;  %v27_v15 = vadd.s32 56, %v548_v2 }
   0x8   :  { %443 = vmatpush3.msk.msra.mxu0 %vm55_vm0, %v519_v10  ;;  %481 = vmatpush3.msk.msra.mxu1 %vm196_vm1, %v519_v10  ;;  %vm193_vm7 = vcmp.eq.s32.totalorder %v32_v9, %v561_v5  ;;  %vm51_vm8 = vcmp.eq.s32.totalorder %v31_v11, %v556_v4  ;;  %vm192_vm9 = vcmp.eq.s32.totalorder %v31_v11, %v561_v5  ;;  %v26_v16 = vadd.s32 48, %v548_v2 }
   0x9   :  { %444 = vmatprep.subr.msk.mxu0 %vm54_vm2, %v519_v10  ;;  %482 = vmatprep.subr.msk.mxu1 %vm195_vm3, %v519_v10  ;;  %vm50_vm10 = vcmp.eq.s32.totalorder %v30_v12, %v556_v4  ;;  %vm191_vm11 = vcmp.eq.s32.totalorder %v30_v12, %v561_v5  ;;  %vm49_vm12 = vcmp.eq.s32.totalorder %v29_v13, %v556_v4  ;;  %v25_v17 = vadd.s32 40, %v548_v2 }
   0xa   :  { %445 = vmatpush3.msk.msra.mxu0 %vm54_vm2, %v519_v10  ;;  %483 = vmatpush3.msk.msra.mxu1 %vm195_vm3, %v519_v10  ;;  %vm190_vm13 = vcmp.eq.s32.totalorder %v29_v13, %v561_v5  ;;  %vm48_vm14 = vcmp.eq.s32.totalorder %v28_v14, %v556_v4  ;;  %vm189_vm15 = vcmp.eq.s32.totalorder %v28_v14, %v561_v5  ;;  %v24_v18 = vadd.s32 32, %v548_v2 }
   0xb   :  { %446 = vmatprep.subr.msk.mxu0 %vm53_vm4, %v519_v10  ;;  %484 = vmatprep.subr.msk.mxu1 %vm194_vm5, %v519_v10  ;;  %vm47_vm0 = vcmp.eq.s32.totalorder %v27_v15, %v556_v4  ;;  %vm188_vm1 = vcmp.eq.s32.totalorder %v27_v15, %v561_v5  ;;  %vm46_vm2 = vcmp.eq.s32.totalorder %v26_v16, %v556_v4  ;;  %v23_v19 = vadd.s32 24, %v548_v2 }
   0xc   :  { %447 = vmatpush3.msk.msra.mxu0 %vm53_vm4, %v519_v10  ;;  %485 = vmatpush3.msk.msra.mxu1 %vm194_vm5, %v519_v10  ;;  %vm187_vm3 = vcmp.eq.s32.totalorder %v26_v16, %v561_v5  ;;  %vm45_vm4 = vcmp.eq.s32.totalorder %v25_v17, %v556_v4  ;;  %vm186_vm5 = vcmp.eq.s32.totalorder %v25_v17, %v561_v5  ;;  %v22_v20 = vadd.s32 16, %v548_v2 }
   0xd   :  { %448 = vmatprep.subr.msk.mxu0 %vm52_vm6, %v519_v10  ;;  %486 = vmatprep.subr.msk.mxu1 %vm193_vm7, %v519_v10  ;;  %v21_v21 = vadd.s32 8, %v548_v2 }
   0xe   :  { %449 = vmatpush3.msk.msra.mxu0 %vm52_vm6, %v519_v10  ;;  %487 = vmatpush3.msk.msra.mxu1 %vm193_vm7, %v519_v10  ;;  %vm44_vm6 = vcmp.eq.s32.totalorder %v24_v18, %v556_v4  ;;  %vm185_vm7 = vcmp.eq.s32.totalorder %v24_v18, %v561_v5 }
   0xf   :  { %450 = vmatprep.subr.msk.mxu0 %vm51_vm8, %v519_v10  ;;  %488 = vmatprep.subr.msk.mxu1 %vm192_vm9, %v519_v10 }
  0x10   :  { %451 = vmatpush3.msk.msra.mxu0 %vm51_vm8, %v519_v10  ;;  %489 = vmatpush3.msk.msra.mxu1 %vm192_vm9, %v519_v10  ;;  %vm43_vm8 = vcmp.eq.s32.totalorder %v23_v19, %v556_v4  ;;  %vm184_vm9 = vcmp.eq.s32.totalorder %v23_v19, %v561_v5 }
  0x11   :  { %452 = vmatprep.subr.msk.mxu0 %vm50_vm10, %v519_v10  ;;  %490 = vmatprep.subr.msk.mxu1 %vm191_vm11, %v519_v10 }
  0x12   :  { %453 = vmatpush3.msk.msra.mxu0 %vm50_vm10, %v519_v10  ;;  %491 = vmatpush3.msk.msra.mxu1 %vm191_vm11, %v519_v10  ;;  %vm42_vm10 = vcmp.eq.s32.totalorder %v22_v20, %v556_v4  ;;  %vm183_vm11 = vcmp.eq.s32.totalorder %v22_v20, %v561_v5 }
  0x13   :  { %454 = vmatprep.subr.msk.mxu0 %vm49_vm12, %v519_v10  ;;  %492 = vmatprep.subr.msk.mxu1 %vm190_vm13, %v519_v10 }
  0x14   :  { %455 = vmatpush3.msk.msra.mxu0 %vm49_vm12, %v519_v10  ;;  %493 = vmatpush3.msk.msra.mxu1 %vm190_vm13, %v519_v10  ;;  %vm41_vm12 = vcmp.eq.s32.totalorder %v21_v21, %v556_v4  ;;  %vm182_vm13 = vcmp.eq.s32.totalorder %v21_v21, %v561_v5 }
  0x15   :  { %456 = vmatprep.subr.msk.mxu0 %vm48_vm14, %v519_v10  ;;  %494 = vmatprep.subr.msk.mxu1 %vm189_vm15, %v519_v10 }
  0x16   :  { %457 = vmatpush3.msk.msra.mxu0 %vm48_vm14, %v519_v10  ;;  %495 = vmatpush3.msk.msra.mxu1 %vm189_vm15, %v519_v10  ;;  %vm40_vm14 = vcmp.eq.s32.totalorder %v548_v2, %v556_v4  ;;  %vm181_vm15 = vcmp.eq.s32.totalorder %v548_v2, %v561_v5 }
  0x17   :  { %458 = vmatprep.subr.msk.mxu0 %vm47_vm0, %v519_v10  ;;  %496 = vmatprep.subr.msk.mxu1 %vm188_vm1, %v519_v10 }
  0x18   :  { %459 = vmatpush3.msk.msra.mxu0 %vm47_vm0, %v519_v10  ;;  %497 = vmatpush3.msk.msra.mxu1 %vm188_vm1, %v519_v10 }
  0x19   :  { %460 = vmatprep.subr.msk.mxu0 %vm46_vm2, %v519_v10  ;;  %498 = vmatprep.subr.msk.mxu1 %vm187_vm3, %v519_v10 }
  0x1a   :  { %461 = vmatpush3.msk.msra.mxu0 %vm46_vm2, %v519_v10  ;;  %499 = vmatpush3.msk.msra.mxu1 %vm187_vm3, %v519_v10 }
  0x1b   :  { %462 = vmatprep.subr.msk.mxu0 %vm45_vm4, %v519_v10  ;;  %500 = vmatprep.subr.msk.mxu1 %vm186_vm5, %v519_v10 }
  0x1c   :  { %463 = vmatpush3.msk.msra.mxu0 %vm45_vm4, %v519_v10  ;;  %501 = vmatpush3.msk.msra.mxu1 %vm186_vm5, %v519_v10 }
  0x1d   :  { %464 = vmatprep.subr.msk.mxu0 %vm44_vm6, %v519_v10  ;;  %502 = vmatprep.subr.msk.mxu1 %vm185_vm7, %v519_v10 }
  0x1e   :  { %465 = vmatpush3.msk.msra.mxu0 %vm44_vm6, %v519_v10  ;;  %503 = vmatpush3.msk.msra.mxu1 %vm185_vm7, %v519_v10 }
  0x1f   :  { %466 = vmatprep.subr.msk.mxu0 %vm43_vm8, %v519_v10  ;;  %504 = vmatprep.subr.msk.mxu1 %vm184_vm9, %v519_v10 }
  0x20   :  { %467 = vmatpush3.msk.msra.mxu0 %vm43_vm8, %v519_v10  ;;  %505 = vmatpush3.msk.msra.mxu1 %vm184_vm9, %v519_v10 }
  0x21   :  { %468 = vmatprep.subr.msk.mxu0 %vm42_vm10, %v519_v10  ;;  %506 = vmatprep.subr.msk.mxu1 %vm183_vm11, %v519_v10 }
  0x22   :  { %469 = vmatpush3.msk.msra.mxu0 %vm42_vm10, %v519_v10  ;;  %507 = vmatpush3.msk.msra.mxu1 %vm183_vm11, %v519_v10 }
  0x23   :  { %470 = vmatprep.subr.msk.mxu0 %vm41_vm12, %v519_v10  ;;  %508 = vmatprep.subr.msk.mxu1 %vm182_vm13, %v519_v10 }
  0x24   :  { %471 = vmatpush3.msk.msra.mxu0 %vm41_vm12, %v519_v10  ;;  %509 = vmatpush3.msk.msra.mxu1 %vm182_vm13, %v519_v10 }
  0x25   :  { %472 = vmatprep.subr.msk.mxu0 %vm40_vm14, %v519_v10  ;;  %510 = vmatprep.subr.msk.mxu1 %vm181_vm15, %v519_v10 }
  0x26   :  { %473 = vmatpush3.msk.msra.mxu0 %vm40_vm14, %v519_v10  ;;  %511 = vmatpush3.msk.msra.mxu1 %vm181_vm15, %v519_v10 }
  0x27   :  { %475 = vmatmul.mubr.f32.vlgmr.msra.gmra.mxu0 %v89_v22  ;;  %513 = vmatmul.mubr.f32.vlgmr.msra.gmra.mxu1 %v230_v23 }
  0x28   :  { %477 = vmatprep.mubr.f32.mxu0 %v90_v24  ;;  %515 = vmatprep.mubr.f32.mxu1 %v231_v25 }
  0x2b   :  { %478 = vmatmul.mubr.f32.gmra.mxu0 %v91_v26  ;;  %516 = vmatmul.mubr.f32.gmra.mxu1 %v232_v27 }
  0xe7   :  { %v476_v28 = vpop.f32.mrf.mxu0  ;;  %v514_v29 = vpop.f32.mrf.mxu1 }
  0xe8   :  { %v319_v35 = vmul.f32 %v514_v29, %v476_v28 }
  0xe9   :  { %v158_v30 = vpop.f32.mrf.mxu0  ;;  %v299_v31 = vpop.f32.mrf.mxu1 }
  0xea   :  { %v318_v32 = vmul.f32 %v299_v31, %v158_v30 }
  0xeb   :  { %v479_v33 = vpop.f32.mrf.mxu0  ;;  %v517_v34 = vpop.f32.mrf.mxu1 }
  0xec   :  { %v322_v38 = vadd.f32 %v319_v35, %v318_v32  ;;  %v321_v40 = vmul.f32 %v517_v34, %v479_v33 }
  0xed   :  { %v168_v36 = vpop.f32.mrf.mxu0  ;;  %v309_v37 = vpop.f32.mrf.mxu1 }
  0xee   :  { %v320_v39 = vmul.f32 %v309_v37, %v168_v36 }
  0xf0   :  { %v323_v41 = vadd.f32 %v322_v38, %v320_v39 }
  0xf2   :  { %v324_v42 = vadd.f32 %v323_v41, %v321_v40 }
  0xf4   :  { %v325_v43 = vrot.slane %v324_v42, 4 }
  0xf6   :  { %v326_v44 = vadd.f32 %v325_v43, %v324_v42 }
  0xf8   :  { %v327_v45 = vrot.slane %v326_v44, 2 }
  0xfa   :  { %v328_v46 = vadd.f32 %v327_v45, %v326_v44 }
  0xfc   :  { %v329_v47 = vrot.slane %v328_v46, 1 }
  0xfe   :  { %v330_v48 = vadd.f32 %v329_v47, %v328_v46 }
 0x100   :  { %331 = vst [vmem:[%s701_s4] sm:$0x1] %v330_v48 }

</bundles_post_ra>
